<compile_context>
chip_gen: v6e
topology: v6e:2x2x1
jax: 0.10.0
libtpu: 0.0.40
codegen_flags: <defaults>
</compile_context>

<pallas_src>
import math
import functools

import jax
import jax.numpy as jnp
from jax.experimental import pallas as pl
from jax.experimental.pallas import tpu as pltpu


# above the v5e/v6e scoped defaults (16/32 MiB), below v7x's 64 MiB physical
_VMEM_LIMIT_BYTES = 48 * 1024 * 1024


# ----------------------------- tiling helpers ------------------------------ #

def _round_up(n, m):
    return ((n + m - 1) // m) * m


def _tile_for(dim, candidates):
    """Largest MXU-friendly candidate <= dim; small dims use the full dim."""
    for c in candidates:
        if dim >= c:
            return c
    return max(int(dim), 1)


# ---------------------- tiled linear:  y = x @ w_t + b --------------------- #

def _linear_kernel(x_ref, w_ref, b_ref, o_ref, *acc):
    # acc is an optional f32 VMEM scratch; when absent we accumulate directly
    # into the resident f32 output block (saves tm*tn*4 B of VMEM + a copy).
    acc_ref = acc[0] if acc else o_ref
    k = pl.program_id(2)

    @pl.when(k == 0)
    def _():
        acc_ref[...] = jnp.zeros_like(acc_ref)

    acc_ref[...] += jnp.dot(
        x_ref[...], w_ref[...], preferred_element_type=jnp.float32
    )

    @pl.when(k == pl.num_programs(2) - 1)
    def _():
        o_ref[...] = (acc_ref[...] + b_ref[...]).astype(o_ref.dtype)


def pallas_linear(x2d, w_t, b, *, out_dtype=jnp.float32):
    """x2d: (M, K), w_t: (K, N) (pre-transposed), b: (N,) -> (M, N)."""
    M, K = x2d.shape
    N = w_t.shape[1]
    tm = _tile_for(M, (256, 128))
    tn = _tile_for(N, (256, 128))
    tk = _tile_for(K, (512, 256, 128))
    Mp, Np, Kp = _round_up(M, tm), _round_up(N, tn), _round_up(K, tk)

    # pad to tile multiples (zeros do not change the matmul result)
    if Mp != M or Kp != K:
        x2d = jnp.pad(x2d, ((0, Mp - M), (0, Kp - K)))
    if Kp != K or Np != N:
        w_t = jnp.pad(w_t, ((0, Kp - K), (0, Np - N)))
    if Np != N:
        b = jnp.pad(b, (0, Np - N))
    b2d = b.reshape(1, Np).astype(jnp.float32)

    # f32 scratch accumulator only needed when the output itself is not f32
    needs_acc = jnp.dtype(out_dtype) != jnp.dtype(jnp.float32)
    scratch = [pltpu.VMEM((tm, tn), jnp.float32)] if needs_acc else []

    out = pl.pallas_call(
        _linear_kernel,
        out_shape=jax.ShapeDtypeStruct((Mp, Np), out_dtype),
        grid=(Mp // tm, Np // tn, Kp // tk),
        in_specs=[
            pl.BlockSpec((tm, tk), lambda i, j, k: (i, k)),
            pl.BlockSpec((tk, tn), lambda i, j, k: (k, j)),
            pl.BlockSpec((1, tn), lambda i, j, k: (0, j)),
        ],
        out_specs=pl.BlockSpec((tm, tn), lambda i, j, k: (i, j)),
        scratch_shapes=scratch,
        compiler_params=pltpu.CompilerParams(
            dimension_semantics=("parallel", "parallel", "arbitrary"),
            vmem_limit_bytes=_VMEM_LIMIT_BYTES,
        ),
    )(x2d, w_t, b2d)

    if Mp != M or Np != N:
        out = out[:M, :N]
    return out


# ------------------ flash-style fused multi-head attention ----------------- #

def _attention_kernel(q_ref, kv_ref, o_ref, m_ref, l_ref, acc_ref, *,
                      num_heads, head_dim, seq_len, kv_tile, approx_recip):
    # q_ref : (tq,  E)   query tile, scale already folded into W_q
    # kv_ref: (tkv, 2E)  [K_all | V_all] tile of the sequence
    # o_ref : (tq,  E)   output tile
    # scratch (persist across the kv grid axis):
    #   m_ref  (H, tq, 1)   running max
    #   l_ref  (H, tq, 1)   running softmax denominator
    #   acc_ref(H, tq, Dh)  running weighted-value accumulator
    H, Dh = num_heads, head_dim
    E = H * Dh
    ki = pl.program_id(2)

    @pl.when(ki == 0)
    def _():
        m_ref[...] = jnp.full_like(m_ref, -jnp.inf)
        l_ref[...] = jnp.zeros_like(l_ref)
        acc_ref[...] = jnp.zeros_like(acc_ref)

    tq = q_ref.shape[0]
    tkv = kv_ref.shape[0]

    kv = kv_ref[...]
    q3 = q_ref[...].reshape(tq, H, Dh).swapaxes(0, 1)    # (H, tq,  Dh)
    k3 = kv[:, :E].reshape(tkv, H, Dh).swapaxes(0, 1)    # (H, tkv, Dh)
    v3 = kv[:, E:].reshape(tkv, H, Dh).swapaxes(0, 1)    # (H, tkv, Dh)

    # head-batched Q.K^T (batch dim leading, contraction on head_dim)
    logits = jnp.einsum("hqd,hkd->hqk", q3, k3,
                        preferred_element_type=jnp.float32)   # (H, tq, tkv)

    # mask KV columns that are sequence padding (static: only when S % tkv != 0)
    if seq_len % kv_tile != 0:
        col = jax.lax.broadcasted_iota(jnp.int32, (1, 1, tkv), 2) + ki * kv_tile
        logits = jnp.where(col < seq_len, logits, jnp.float32(-1e30))

    # online softmax update
    m_prev = m_ref[...]
    m_new = jnp.maximum(m_prev, jnp.max(logits, axis=-1, keepdims=True))
    alpha = jnp.exp(m_prev - m_new)
    p = jnp.exp(logits - m_new)                               # (H, tq, tkv)
    l_ref[...] = alpha * l_ref[...] + jnp.sum(p, axis=-1, keepdims=True)
    pv = jnp.einsum("hqk,hkd->hqd", p.astype(v3.dtype), v3,
                    preferred_element_type=jnp.float32)        # (H, tq, Dh)
    acc_ref[...] = alpha * acc_ref[...] + pv
    m_ref[...] = m_new

    @pl.when(ki == pl.num_programs(2) - 1)
    def _():
        inv_l = pl.reciprocal(l_ref[...], approx=approx_recip)  # (H, tq, 1)
        out = acc_ref[...] * inv_l                              # (H, tq, Dh)
        # single lane-dense store of the full (tq, E) output block
        o_ref[...] = out.swapaxes(0, 1).reshape(tq, E).astype(o_ref.dtype)


def pallas_attention(q, kv, num_heads, head_dim, *, seq_len, seq_tile,
                     out_dtype, approx_recip):
    """q: (B, S_pad, E), kv: (B, S_pad, 2E) [K_all|V_all] -> (B, S_pad, E)."""
    B, S_pad, E = q.shape
    tq = tkv = seq_tile
    H, Dh = num_heads, head_dim

    kernel = functools.partial(
        _attention_kernel, num_heads=H, head_dim=Dh, seq_len=seq_len,
        kv_tile=tkv, approx_recip=approx_recip)

    return pl.pallas_call(
        kernel,
        out_shape=jax.ShapeDtypeStruct((B, S_pad, E), out_dtype),
        grid=(B, S_pad // tq, S_pad // tkv),
        in_specs=[
            # q tile: block index constant across ki -> stays resident
            pl.BlockSpec((pl.Squeezed(), tq, E), lambda b, qi, ki: (b, qi, 0)),
            # kv tile streams along the last ("arbitrary") grid axis
            pl.BlockSpec((pl.Squeezed(), tkv, 2 * E), lambda b, qi, ki: (b, ki, 0)),
        ],
        out_specs=pl.BlockSpec((pl.Squeezed(), tq, E), lambda b, qi, ki: (b, qi, 0)),
        scratch_shapes=[
            pltpu.VMEM((H, tq, 1), jnp.float32),    # m
            pltpu.VMEM((H, tq, 1), jnp.float32),    # l
            pltpu.VMEM((H, tq, Dh), jnp.float32),   # acc
        ],
        compiler_params=pltpu.CompilerParams(
            dimension_semantics=("parallel", "parallel", "arbitrary"),
            vmem_limit_bytes=_VMEM_LIMIT_BYTES,
        ),
    )(q, kv)


# ------------------------------- forward pass ------------------------------ #

def multihead_attention_gt_forward(x, params, num_heads, *,
                                   compute_dtype=jnp.float32):
    """Pallas implementation of MultiheadAttentionGT.forward (mask=None)."""
    B, S, input_dim = x.shape
    embed_dim = params["w_o"].shape[0]
    head_dim = embed_dim // num_heads
    E, Dh = embed_dim, head_dim
    scale = 1.0 / math.sqrt(head_dim)
    approx_recip = jnp.dtype(compute_dtype) == jnp.dtype(jnp.bfloat16)

    # ---- one-time (trace-time) weight prep -------------------------------- #
    # Torch layout: channel c of qkv_proj -> head h = c // (3*Dh), within-head
    # [q|k|v] each Dh wide.  Reorder rows to packed [Q_all | K_all | V_all]
    # (head-major inside each group) and split into Q / KV projections.
    ids = jnp.arange(E)
    h_idx, d_idx = ids // Dh, ids % Dh
    q_rows = 3 * Dh * h_idx + d_idx
    k_rows = q_rows + Dh
    v_rows = q_rows + 2 * Dh
    kv_rows = jnp.concatenate([k_rows, v_rows])

    w_qkv, b_qkv = params["w_qkv"], params["b_qkv"]
    # fold 1/sqrt(Dh) into the Q projection (free, trace time)
    w_q_t = (w_qkv[q_rows] * scale).T.astype(compute_dtype)    # (in, E)
    b_q = (b_qkv[q_rows] * scale).astype(jnp.float32)
    w_kv_t = w_qkv[kv_rows].T.astype(compute_dtype)            # (in, 2E)
    b_kv = b_qkv[kv_rows].astype(jnp.float32)
    w_o_t = params["w_o"].T.astype(compute_dtype)               # (E, E)
    b_o = params["b_o"].astype(jnp.float32)

    # ---- pad the sequence to the attention tile ---------------------------- #
    t_s = _tile_for(S, (256, 128))
    S_pad = _round_up(S, t_s)
    if S_pad != S:
        x = jnp.pad(x, ((0, 0), (0, S_pad - S), (0, 0)))

    x2d = x.reshape(B * S_pad, input_dim).astype(compute_dtype)

    # Q / KV projections (separate outputs -> no duplicate HBM reads later)
    q = pallas_linear(x2d, w_q_t, b_q, out_dtype=compute_dtype)
    kv = pallas_linear(x2d, w_kv_t, b_kv, out_dtype=compute_dtype)
    q = q.reshape(B, S_pad, E)
    kv = kv.reshape(B, S_pad, 2 * E)

    # flash-style fused attention; output already in (B, S_pad, E) layout
    values = pallas_attention(q, kv, num_heads, head_dim, seq_len=S,
                              seq_tile=t_s, out_dtype=compute_dtype,
                              approx_recip=approx_recip)

    # output projection (always f32 result)
    o = pallas_linear(values.reshape(B * S_pad, E), w_o_t, b_o,
                      out_dtype=jnp.float32)
    o = o.reshape(B, S_pad, E)
    return o[:, :S] if S_pad != S else o


# ----------------------- Deterministic parameter init ---------------------- #

def xavier_uniform(key, shape):
    # torch nn.init.xavier_uniform_ on a (out, in) Linear weight
    fan_out, fan_in = shape
    limit = math.sqrt(6.0 / (fan_in + fan_out))
    return jax.random.uniform(
        key, shape, dtype=jnp.float32, minval=-limit, maxval=limit
    )


def init_params(key, input_dim, embed_dim):
    k1, k2 = jax.random.split(key)
    return {
        "w_qkv": xavier_uniform(k1, (3 * embed_dim, input_dim)),
        "b_qkv": jnp.zeros((3 * embed_dim,), jnp.float32),
        "w_o": xavier_uniform(k2, (embed_dim, embed_dim)),
        "b_o": jnp.zeros((embed_dim,), jnp.float32),
    }


# ------------------------------ Reference ---------------------------------- #

def reference_forward(x, params, num_heads):
    B, S, _ = x.shape
    embed_dim = params["w_o"].shape[0]
    head_dim = embed_dim // num_heads
    with jax.default_matmul_precision("highest"):
        qkv = x @ params["w_qkv"].T + params["b_qkv"]
        qkv = qkv.reshape(B, S, num_heads, 3 * head_dim).transpose(0, 2, 1, 3)
        q, k, v = jnp.split(qkv, 3, axis=-1)
        logits = jnp.einsum("bhqd,bhkd->bhqk", q, k) / math.sqrt(head_dim)
        attn = jax.nn.softmax(logits, axis=-1)
        vals = jnp.einsum("bhqk,bhkd->bhqd", attn, v)
        vals = vals.transpose(0, 2, 1, 3).reshape(B, S, embed_dim)
        return vals @ params["w_o"].T + params["b_o"]


# --------------------------------- Main ------------------------------------ #

if __name__ == "__main__":
    B, S, input_dim = 2, 8, 16
    embed_dim, num_heads = 32, 4

    key = jax.random.PRNGKey(0)
    kx, kp = jax.random.split(key)
    x = jax.random.normal(kx, (B, S, input_dim), dtype=jnp.float32)
    params = init_params(kp, input_dim, embed_dim)
    ref = reference_forward(x, params, num_heads)

    # f32 path (exact reciprocal), tight tolerance
    out = multihead_attention_gt_forward(x, params, num_heads)
    out = jax.block_until_ready(out)
    assert out.shape == (B, S, embed_dim)
    assert jnp.allclose(out, ref, atol=1e-3, rtol=1e-3), "f32 mismatch vs reference"

    # bf16 MXU-operand path (approx reciprocal), looser tolerance
    out_bf16 = multihead_attention_gt_forward(
        x, params, num_heads, compute_dtype=jnp.bfloat16)
    out_bf16 = jax.block_until_ready(out_bf16)
    assert jnp.allclose(out_bf16, ref, atol=8e-2, rtol=8e-2), "bf16 mismatch"

    # longer, non-tile-multiple sequence: exercises flash KV tiling + padding mask
    S2 = 200
    x2 = jax.random.normal(jax.random.PRNGKey(1), (B, S2, input_dim), jnp.float32)
    out2 = multihead_attention_gt_forward(x2, params, num_heads)
    out2 = jax.block_until_ready(out2)
    ref2 = reference_forward(x2, params, num_heads)
    assert out2.shape == (B, S2, embed_dim)
    assert jnp.allclose(out2, ref2, atol=1e-3, rtol=1e-3), "flash/mask mismatch"

    print("KERNEL_OK")
</pallas_src>

<mosaic_0001>
module attributes {stable_mosaic.version = 11 : i64} {
  func.func @_linear_kernel(%arg0: i32, %arg1: i32, %arg2: i32, %arg3: memref<16x16xf32, #tpu.memory_space<vmem>>, %arg4: memref<16x32xf32, #tpu.memory_space<vmem>>, %arg5: memref<1x32xf32, #tpu.memory_space<vmem>>, %arg6: memref<16x32xf32, #tpu.memory_space<vmem>>) attributes {dimension_semantics = [#tpu.dimension_semantics<parallel>, #tpu.dimension_semantics<parallel>, #tpu.dimension_semantics<arbitrary>], iteration_bounds = array<i64: 1, 1, 1>, scalar_prefetch = 0 : i64, scratch_operands = 0 : i64, tpu.core_type = #tpu.core_type<tc>, window_params = [{transform_indices = @transform_0, window_bounds = array<i64: 16, 16>}, {transform_indices = @transform_1, window_bounds = array<i64: 16, 32>}, {transform_indices = @transform_2, window_bounds = array<i64: 1, 32>}, {transform_indices = @transform_3, window_bounds = array<i64: 16, 32>}]} {
    %c0_i32 = arith.constant 0 : i32
    %0 = arith.cmpi eq, %arg2, %c0_i32 : i32
    %1 = arith.extui %0 : i1 to i32
    %c0_i32_0 = arith.constant 0 : i32
    %2 = arith.cmpi ne, %1, %c0_i32_0 : i32
    scf.if %2 {
      %cst_10 = arith.constant 0.000000e+00 : f32
      %12 = vector.broadcast %cst_10 : f32 to vector<16x32xf32>
      %c0_11 = arith.constant 0 : index
      %c0_12 = arith.constant 0 : index
      %13 = vector.load %arg6[%c0_11, %c0_12] : memref<16x32xf32, #tpu.memory_space<vmem>>, vector<16x32xf32>
      tpu.vector_store %arg6[%c0_11, %c0_12], %12 {strides = array<i32>} : memref<16x32xf32, #tpu.memory_space<vmem>>, vector<16x32xf32>,
    } else {
    }
    %c0 = arith.constant 0 : index
    %c0_1 = arith.constant 0 : index
    %3 = vector.load %arg6[%c0, %c0_1] : memref<16x32xf32, #tpu.memory_space<vmem>>, vector<16x32xf32>
    %c0_2 = arith.constant 0 : index
    %c0_3 = arith.constant 0 : index
    %4 = vector.load %arg3[%c0_2, %c0_3] : memref<16x16xf32, #tpu.memory_space<vmem>>, vector<16x16xf32>
    %c0_4 = arith.constant 0 : index
    %c0_5 = arith.constant 0 : index
    %5 = vector.load %arg4[%c0_4, %c0_5] : memref<16x32xf32, #tpu.memory_space<vmem>>, vector<16x32xf32>
    %cst = arith.constant dense<0.000000e+00> : vector<16x32xf32>
    %6 = tpu.matmul %4, %5, %cst {dimension_numbers = #tpu.dot_dimension_numbers<[1], [0], [0], [1], [0, 0, 1, 1], [], []>} : vector<16x16xf32>, vector<16x32xf32>, vector<16x32xf32> -> vector<16x32xf32>
    %7 = arith.addf %3, %6 : vector<16x32xf32>
    %c0_6 = arith.constant 0 : index
    %c0_7 = arith.constant 0 : index
    %8 = vector.load %arg6[%c0_6, %c0_7] : memref<16x32xf32, #tpu.memory_space<vmem>>, vector<16x32xf32>
    tpu.vector_store %arg6[%c0_6, %c0_7], %7 {strides = array<i32>} : memref<16x32xf32, #tpu.memory_space<vmem>>, vector<16x32xf32>,
    %c0_i32_8 = arith.constant 0 : i32
    %9 = arith.cmpi eq, %arg2, %c0_i32_8 : i32
    %10 = arith.extui %9 : i1 to i32
    %c0_i32_9 = arith.constant 0 : i32
    %11 = arith.cmpi ne, %10, %c0_i32_9 : i32
    scf.if %11 {
      %c0_10 = arith.constant 0 : index
      %c0_11 = arith.constant 0 : index
      %12 = vector.load %arg6[%c0_10, %c0_11] : memref<16x32xf32, #tpu.memory_space<vmem>>, vector<16x32xf32>
      %c0_12 = arith.constant 0 : index
      %c0_13 = arith.constant 0 : index
      %13 = vector.load %arg5[%c0_12, %c0_13] : memref<1x32xf32, #tpu.memory_space<vmem>>, vector<1x32xf32>
      %14 = vector.broadcast %13 : vector<1x32xf32> to vector<16x32xf32>
      %15 = arith.addf %12, %14 : vector<16x32xf32>
      %c0_14 = arith.constant 0 : index
      %c0_15 = arith.constant 0 : index
      %16 = vector.load %arg6[%c0_14, %c0_15] : memref<16x32xf32, #tpu.memory_space<vmem>>, vector<16x32xf32>
      tpu.vector_store %arg6[%c0_14, %c0_15], %15 {strides = array<i32>} : memref<16x32xf32, #tpu.memory_space<vmem>>, vector<16x32xf32>,
    } else {
    }
    return
  }
  func.func @transform_0(%arg0: i32, %arg1: i32, %arg2: i32) -> (i32, i32) {
    %c0_i32 = arith.constant 0 : i32
    return %arg0, %arg2 : i32, i32
  }
  func.func @transform_1(%arg0: i32, %arg1: i32, %arg2: i32) -> (i32, i32) {
    %c0_i32 = arith.constant 0 : i32
    return %arg2, %arg1 : i32, i32
  }
  func.func @transform_2(%arg0: i32, %arg1: i32, %arg2: i32) -> (i32, i32) {
    %c0_i32 = arith.constant 0 : i32
    %c0_i32_0 = arith.constant 0 : i32
    return %c0_i32, %arg1 : i32, i32
  }
  func.func @transform_3(%arg0: i32, %arg1: i32, %arg2: i32) -> (i32, i32) {
    %c0_i32 = arith.constant 0 : i32
    return %arg0, %arg1 : i32, i32
  }
}

</mosaic_0001>

<bundles_post_ra>
// kernel: tpu_custom_call.1
= control target key start
LH: loop header
LB: loop body
LE: loop exit
PB: predicated region body
PF: predicated region fallthrough
CT: control target
= control target key end

     0   :  { %8 = vsyncpa [#allocation3], 0  ;;  %s316_s0 = inlined_call_operand.hbm [shape: f32[16,16], index: 0, kind: input, shape index: {}]   ;;  %s317_s1 = inlined_call_operand.hbm [shape: f32[16,32], index: 1, kind: input, shape index: {}]   ;;  %s318_s2 = inlined_call_operand.vmem [shape: f32[1,32], index: 2, kind: input, shape index: {}]   ;;  %s319_s3 = inlined_call_operand.hbm [shape: f32[16,32], index: 3, kind: output, shape index: {}]  }
   0x1   :  { %9 = vsyncpa [#allocation6], 0 }
   0x2   :  { %10 = vsyncpa [#allocation4], 0  ;;  %s263_s12 = smov [#allocation2]  }
   0x3   :  { %s16_s13 = sshll.u32 %s263_s12, 4  ;;  %s17_s13 = int_to_ptr.vmem [resolvable:$true] %s16_s13 }
   0x4   :  { %s205_s14 = scalar_lea.vmem %s17_s13, 256  ;;  %p210_p1 = scmp.lt.s32.totalorder %s17_s13, %s17_s13 }
   0x5   :  { %p206_p0 = scmp.ne.s32.totalorder %s17_s13, %s205_s14  ;;  %p211_p2 = scmp.lt.s32.totalorder %s205_s14, %s205_s14 }
   0x7   :  { %p212_p3 = por %p211_p2, %p210_p1 }
   0x9   :  { %p213_p4 = pnand %p212_p3, %p206_p0 }
   0xb   :  { %216 = shalt.err (!%p213_p4)
}
   0xc   :  { %s264_s15 = smov 128   ;;  %s265_s16 = smov 8  }
   0xd   :  { %22 = dma.hbm_to_vmem [thread:$0]  %s316_s0, 256, %s17_s13, [#allocation3], %s264_s15, %s264_s15, %s265_s16  }
   0xe   :  { %s266_s19 = smov [#allocation5]  }
   0xf   :  { %s28_s20 = sshll.u32 %s266_s19, 4  ;;  %s29_s20 = int_to_ptr.vmem [resolvable:$true] %s28_s20 }
  0x10   :  { %s225_s21 = scalar_lea.vmem %s29_s20, 256  ;;  %p230_p6 = scmp.lt.s32.totalorder %s29_s20, %s29_s20 }
  0x11   :  { %p226_p5 = scmp.ne.s32.totalorder %s29_s20, %s225_s21  ;;  %p231_p7 = scmp.lt.s32.totalorder %s225_s21, %s225_s21 }
  0x13   :  { %p232_p8 = por %p231_p7, %p230_p6 }
  0x15   :  { %p233_p9 = pnand %p232_p8, %p226_p5 }
  0x17   :  { %236 = shalt.err (!%p233_p9)
}
  0x18   :  { %34 = dma.hbm_to_vmem [thread:$0]  %s317_s1, 256, %s29_s20, [#allocation6], %s264_s15, %s264_s15, %s265_s16  }
  0x19   :  { %257 = dma.done.wait [#allocation3], 256  }
  0x1a   :  { %258 = vsyncadd [#allocation3], 4294967040 }
  0x1b   :  { %259 = dma.done.wait [#allocation6], 256  }
  0x1c   :  { %260 = vsyncadd [#allocation6], 4294967040  ;;  %vm47_vm0 = vcmask 261120   ;;  %v267_v0 = vmov 0.0   ;;  %vm56_vm1 = vcmask 130048   ;;  %v55_v1 = vld [vmem:[#allocation5 + $0x8] sm:$0xff] }
  0x1d   :  { %49 = vst.msk [vmem:[#allocation7 + $0x8] sm:$0xff] %vm47_vm0, %v267_v0  ;;  %48 = vst.msk [vmem:[#allocation7] sm:$0xff] %vm47_vm0, %v267_v0  ;;  %v54_v2 = vld [vmem:[#allocation5] sm:$0xff]  ;;  %v52_v3 = vld [vmem:[#allocation2] sm:$0xff]  ;;  %184 = vmatprep.subr.mxu0 %v55_v1  ;;  %s268_s24 = smov [#allocation7]  }
  0x1e   :  { %188 = vmatprep.mubr.msk.f32.mxu0 %vm56_vm1, %v52_v3  ;;  %185 = vmatpush3.msra.mxu0 %v55_v1  ;;  %v53_v4 = vld [vmem:[#allocation2 + $0x8] sm:$0xff]  ;;  %v179_v11 = vld [vmem:[%s318_s2] ss:$0 sm:$0xff]  ;;  %s164_s25 = sshll.u32 %s268_s24, 4  ;;  %s165_s25 = int_to_ptr.vmem [resolvable:$true] %s164_s25 }
  0x1f   :  { %186 = vmatprep.subr.mxu0 %v54_v2  ;;  %s237_s26 = scalar_lea.vmem %s165_s25, 256  ;;  %p242_p11 = scmp.lt.s32.totalorder %s165_s25, %s165_s25 }
  0x20   :  { %187 = vmatpush3.msra.mxu0 %v54_v2  ;;  %p238_p10 = scmp.ne.s32.totalorder %s165_s25, %s237_s26  ;;  %p243_p12 = scmp.lt.s32.totalorder %s237_s26, %s237_s26 }
  0x21   :  { %189 = vmatmul.mubr.msk.f32.vlgmr.msra.gmra.mxu0 %vm56_vm1, %v53_v4 }
  0x22   :  { %p244_p13 = por %p243_p12, %p242_p11 }
  0x24   :  { %v51_v5 = vld [vmem:[#allocation7 + $0x8] sm:$0xff]  ;;  %v50_v7 = vld [vmem:[#allocation7] sm:$0xff]  ;;  %p245_p0 = pnand %p244_p13, %p238_p10 }
  0xe1   :  { %v190_v6 = vpop.f32.mrf.mxu0 }
  0xe2   :  { %v139_v8 = vadd.f32 %v190_v6, %v51_v5 }
  0xe3   :  { %v129_v9 = vpop.f32.mrf.mxu0 }
  0xe4   :  { %142 = vst.msk [vmem:[#allocation7 + $0x8] sm:$0xff] %vm47_vm0, %v139_v8  ;;  %v138_v10 = vadd.f32 %v129_v9, %v50_v7 }
  0xe6   :  { %141 = vst.msk [vmem:[#allocation7] sm:$0xff] %vm47_vm0, %v138_v10 }
  0xeb   :  { %v147_v12 = vld [vmem:[#allocation7 + $0x8] sm:$0xff] }
  0xec   :  { %v156_v13 = vadd.f32 %v179_v11, %v147_v12 }
  0xed   :  { %v146_v14 = vld [vmem:[#allocation7] sm:$0xff] }
  0xee   :  { %v155_v15 = vadd.f32 %v179_v11, %v146_v14  ;;  %158 = vst.msk [vmem:[#allocation7 + $0x8] sm:$0xff] %vm47_vm0, %v156_v13 }
  0xf0   :  { %157 = vst.msk [vmem:[#allocation7] sm:$0xff] %vm47_vm0, %v155_v15 }
  0xf1   :  { %248 = shalt.err (!%p245_p0)
}
  0xf2   :  { %170 = dma.vmem_to_hbm [thread:$0]  %s165_s25, 256, %s319_s3, [#allocation4], %s264_s15, %s264_s15, %s265_s16  }
  0xf3   :  { %261 = dma.done.wait [#allocation4], 256  }
  0xf4   :  { %262 = vsyncadd [#allocation4], 4294967040 }
  0xf5   :  { %174 = vsyncpa [#allocation3], 1 }
  0xf6   :  { %175 = vsyncpa [#allocation6], 1 }
  0xf7   :  { %176 = vsyncpa [#allocation4], 1 }

</bundles_post_ra>
